<compile_context>
chip_gen: v7x
topology: tpu7x:2x2x1
jax: 0.10.0
libtpu: 0.0.40
codegen_flags: <defaults>
</compile_context>

<pallas_src>
import math

import jax
import jax.numpy as jnp
from jax.experimental import pallas as pl
from jax.experimental.pallas import tpu as pltpu


def _round_up(a, b):
    return -(-a // b) * b


# --------------------------------------------------------------------------
# Pallas kernel
# --------------------------------------------------------------------------
def _fourier_kernel(x_ref, wt_ref, o_ref):
    """x_ref: (tm, K), wt_ref: (K, half), o_ref: (tm, 2*half) or (tm, 2, half)."""
    x = x_ref[...]
    w = wt_ref[...]
    k_dim = x.shape[-1]
    half = w.shape[-1]

    if k_dim <= 8:
        # Tiny K: unrolled broadcast-MAC on the VPU (exact f32, no MXU round trip).
        xf = x.astype(jnp.float32)
        wf = w.astype(jnp.float32)
        acc = xf[:, 0:1] * wf[0:1, :]
        for k in range(1, k_dim):
            acc = acc + xf[:, k:k + 1] * wf[k:k + 1, :]
    else:
        prec = jax.lax.Precision.HIGH if x.dtype == jnp.float32 else None
        acc = jnp.dot(x, w, preferred_element_type=jnp.float32, precision=prec)

    f = (2.0 * math.pi) * acc
    cos_f = jnp.cos(f)   # EUP slot
    sin_f = jnp.sin(f)   # EUP slot

    # Two direct stores -- no (tm, 2*half) concat temp.
    if o_ref.ndim == 3:
        o_ref[:, 0, :] = cos_f.astype(o_ref.dtype)
        o_ref[:, 1, :] = sin_f.astype(o_ref.dtype)
    else:
        o_ref[:, :half] = cos_f.astype(o_ref.dtype)
        o_ref[:, half:] = sin_f.astype(o_ref.dtype)


# --------------------------------------------------------------------------
# Wrapper
# --------------------------------------------------------------------------
def fourier_features(x, weight, *, tile_m=1024):
    """FourierFeatures.forward.

    x:      (..., in_features)
    weight: (out_features // 2, in_features)   -- PyTorch parameter layout
    returns (..., out_features)
    """
    half, in_features = weight.shape
    assert x.shape[-1] == in_features
    out_features = 2 * half

    lead = x.shape[:-1]
    M = int(math.prod(lead)) if lead else 1
    xf = x.reshape(M, in_features)

    wt = jnp.transpose(weight)            # (in_features, half), one-time transpose

    # Sublane multiple for the row tile depends on the input dtype.
    itemsize = jnp.dtype(x.dtype).itemsize
    sub = {4: 8, 2: 16, 1: 32}.get(itemsize, 8)

    lane_dense = (half % 128 == 0)

    # Conservative VMEM sizing (f32 upper bound, double-buffered in/out tiles):
    # stay well under the smallest scoped default (16 MiB on v5e / 32 MiB v6e, v7x).
    in_pad = _round_up(in_features, 128)
    out_row = out_features if lane_dense else 8 * _round_up(half, 128)
    bytes_per_row = 4 * 2 * (in_pad + out_row)
    budget = 12 * 1024 * 1024
    tm_cap = max(sub, (budget // bytes_per_row) // sub * sub)

    tm = min(int(tile_m), tm_cap, _round_up(M, sub))
    tm = max(sub, (tm // sub) * sub)
    # Prefer >= 2 grid steps so both v7x TensorCores get work when M allows it.
    if M > sub and pl.cdiv(M, tm) < 2:
        tm = _round_up(pl.cdiv(M, 2), sub)

    grid = (pl.cdiv(M, tm),)   # ragged last block handled by Pallas masking

    if lane_dense:
        out_shape = jax.ShapeDtypeStruct((M, out_features), x.dtype)
        out_spec = pl.BlockSpec((tm, out_features), lambda i: (i, 0))
    else:
        out_shape = jax.ShapeDtypeStruct((M, 2, half), x.dtype)
        out_spec = pl.BlockSpec((tm, 2, half), lambda i: (i, 0, 0))

    out = pl.pallas_call(
        _fourier_kernel,
        out_shape=out_shape,
        grid=grid,
        in_specs=[
            pl.BlockSpec((tm, in_features), lambda i: (i, 0)),
            pl.BlockSpec((in_features, half), lambda i: (0, 0)),  # VMEM-resident
        ],
        out_specs=out_spec,
        compiler_params=pltpu.CompilerParams(dimension_semantics=("parallel",)),
    )(xf, wt)

    return out.reshape(*lead, out_features)


# --------------------------------------------------------------------------
# Pure-JAX reference for a sanity check
# --------------------------------------------------------------------------
def _ref_fourier_features(x, weight):
    f = 2.0 * math.pi * jnp.einsum(
        "...i,oi->...o", x, weight, precision=jax.lax.Precision.HIGHEST)
    return jnp.concatenate([jnp.cos(f), jnp.sin(f)], axis=-1)


if __name__ == "__main__":
    key = jax.random.PRNGKey(0)
    kx, kw = jax.random.split(key)

    batch, seq, in_features, out_features = 2, 8, 4, 32
    x = jax.random.normal(kx, (batch, seq, in_features), jnp.float32)
    # nn.Parameter(torch.randn([out_features // 2, in_features]) * std), std = 1.0
    weight = jax.random.normal(kw, (out_features // 2, in_features), jnp.float32)

    out = fourier_features(x, weight)
    jax.block_until_ready(out)

    assert out.shape == (batch, seq, out_features), out.shape

    ref = _ref_fourier_features(x, weight)
    assert jnp.allclose(out, ref, atol=1e-4, rtol=1e-4), float(jnp.abs(out - ref).max())

    print("KERNEL_OK")
</pallas_src>

<mosaic_0001>
module attributes {stable_mosaic.version = 11 : i64} {
  func.func @_fourier_kernel(%arg0: i32, %arg1: memref<8x4xf32, #tpu.memory_space<vmem>>, %arg2: memref<4x16xf32, #tpu.memory_space<vmem>>, %arg3: memref<8x2x16xf32, #tpu.memory_space<vmem>>) attributes {dimension_semantics = [#tpu.dimension_semantics<parallel>], iteration_bounds = array<i64: 2>, scalar_prefetch = 0 : i64, scratch_operands = 0 : i64, tpu.core_type = #tpu.core_type<tc>, window_params = [{transform_indices = @transform_0, window_bounds = array<i64: 8, 4>}, {pipeline_mode = #tpu.pipeline_mode<synchronous>, transform_indices = @transform_1, window_bounds = array<i64: 4, 16>}, {transform_indices = @transform_2, window_bounds = array<i64: 8, 2, 16>}]} {
    %c0 = arith.constant 0 : index
    %c0_0 = arith.constant 0 : index
    %0 = vector.load %arg1[%c0, %c0_0] : memref<8x4xf32, #tpu.memory_space<vmem>>, vector<8x4xf32>
    %c0_1 = arith.constant 0 : index
    %c0_2 = arith.constant 0 : index
    %1 = vector.load %arg2[%c0_1, %c0_2] : memref<4x16xf32, #tpu.memory_space<vmem>>, vector<4x16xf32>
    %2 = vector.extract_strided_slice %0 {offsets = [0, 0], sizes = [8, 1], strides = [1, 1]} : vector<8x4xf32> to vector<8x1xf32>
    %3 = vector.extract_strided_slice %1 {offsets = [0, 0], sizes = [1, 16], strides = [1, 1]} : vector<4x16xf32> to vector<1x16xf32>
    %4 = vector.broadcast %2 : vector<8x1xf32> to vector<8x16xf32>
    %5 = vector.broadcast %3 : vector<1x16xf32> to vector<8x16xf32>
    %6 = arith.mulf %4, %5 : vector<8x16xf32>
    %7 = vector.extract_strided_slice %0 {offsets = [0, 1], sizes = [8, 1], strides = [1, 1]} : vector<8x4xf32> to vector<8x1xf32>
    %8 = vector.extract_strided_slice %1 {offsets = [1, 0], sizes = [1, 16], strides = [1, 1]} : vector<4x16xf32> to vector<1x16xf32>
    %9 = vector.broadcast %7 : vector<8x1xf32> to vector<8x16xf32>
    %10 = vector.broadcast %8 : vector<1x16xf32> to vector<8x16xf32>
    %11 = arith.mulf %9, %10 : vector<8x16xf32>
    %12 = arith.addf %6, %11 : vector<8x16xf32>
    %13 = vector.extract_strided_slice %0 {offsets = [0, 2], sizes = [8, 1], strides = [1, 1]} : vector<8x4xf32> to vector<8x1xf32>
    %14 = vector.extract_strided_slice %1 {offsets = [2, 0], sizes = [1, 16], strides = [1, 1]} : vector<4x16xf32> to vector<1x16xf32>
    %15 = vector.broadcast %13 : vector<8x1xf32> to vector<8x16xf32>
    %16 = vector.broadcast %14 : vector<1x16xf32> to vector<8x16xf32>
    %17 = arith.mulf %15, %16 : vector<8x16xf32>
    %18 = arith.addf %12, %17 : vector<8x16xf32>
    %19 = vector.extract_strided_slice %0 {offsets = [0, 3], sizes = [8, 1], strides = [1, 1]} : vector<8x4xf32> to vector<8x1xf32>
    %20 = vector.extract_strided_slice %1 {offsets = [3, 0], sizes = [1, 16], strides = [1, 1]} : vector<4x16xf32> to vector<1x16xf32>
    %21 = vector.broadcast %19 : vector<8x1xf32> to vector<8x16xf32>
    %22 = vector.broadcast %20 : vector<1x16xf32> to vector<8x16xf32>
    %23 = arith.mulf %21, %22 : vector<8x16xf32>
    %24 = arith.addf %18, %23 : vector<8x16xf32>
    %cst = arith.constant 6.28318548 : f32
    %25 = vector.broadcast %cst : f32 to vector<8x16xf32>
    %26 = arith.mulf %25, %24 : vector<8x16xf32>
    %27 = math.cos %26 : vector<8x16xf32>
    %28 = math.sin %26 : vector<8x16xf32>
    %c0_3 = arith.constant 0 : index
    %c0_4 = arith.constant 0 : index
    %c0_5 = arith.constant 0 : index
    %29 = vector.load %arg3[%c0_3, %c0_4, %c0_5] : memref<8x2x16xf32, #tpu.memory_space<vmem>>, vector<8x1x16xf32>
    %30 = vector.shape_cast %29 : vector<8x1x16xf32> to vector<8x16xf32>
    %31 = vector.shape_cast %27 : vector<8x16xf32> to vector<8x1x16xf32>
    tpu.vector_store %arg3[%c0_3, %c0_4, %c0_5], %31 {strides = array<i32>} : memref<8x2x16xf32, #tpu.memory_space<vmem>>, vector<8x1x16xf32>,
    %c0_6 = arith.constant 0 : index
    %c1 = arith.constant 1 : index
    %c0_7 = arith.constant 0 : index
    %32 = vector.load %arg3[%c0_6, %c1, %c0_7] : memref<8x2x16xf32, #tpu.memory_space<vmem>>, vector<8x1x16xf32>
    %33 = vector.shape_cast %32 : vector<8x1x16xf32> to vector<8x16xf32>
    %34 = vector.shape_cast %28 : vector<8x16xf32> to vector<8x1x16xf32>
    tpu.vector_store %arg3[%c0_6, %c1, %c0_7], %34 {strides = array<i32>} : memref<8x2x16xf32, #tpu.memory_space<vmem>>, vector<8x1x16xf32>,
    return
  }
  func.func @transform_0(%arg0: i32) -> (i32, i32) {
    %c0_i32 = arith.constant 0 : i32
    %c0_i32_0 = arith.constant 0 : i32
    return %arg0, %c0_i32 : i32, i32
  }
  func.func @transform_1(%arg0: i32) -> (i32, i32) {
    %c0_i32 = arith.constant 0 : i32
    %c0_i32_0 = arith.constant 0 : i32
    %c0_i32_1 = arith.constant 0 : i32
    return %c0_i32, %c0_i32_0 : i32, i32
  }
  func.func @transform_2(%arg0: i32) -> (i32, i32, i32) {
    %c0_i32 = arith.constant 0 : i32
    %c0_i32_0 = arith.constant 0 : i32
    %c0_i32_1 = arith.constant 0 : i32
    return %arg0, %c0_i32, %c0_i32_0 : i32, i32, i32
  }
}

</mosaic_0001>

<bundles_post_ra>
// kernel: tpu_custom_call.1
= control target key start
LH: loop header
LB: loop body
LE: loop exit
PB: predicated region body
PF: predicated region fallthrough
CT: control target
= control target key end

     0   :  { %7 = vsyncpa [#allocation3], 0  ;;  %s950_s0 = inlined_call_operand.vmem [shape: f32[16,4], index: 0, kind: input, shape index: {}]   ;;  %s951_s1 = inlined_call_operand.vmem [shape: f32[4,16], index: 1, kind: input, shape index: {}]   ;;  %s952_s2 = inlined_call_operand.hbm [shape: f32[16,2,16], index: 2, kind: output, shape index: {}]  }
   0x1   :  { %9 = vsyncpa [#allocation3 + $0x1], 0  ;;  %s777_s9 = smov 0   ;;  %s779_s10 = smov 0  }
   0x2   :  { %s781_s11 = smov 0   ;;  %s783_s12 = smov 0  }
   0x3 LB: > { %s798_s13 = sadd.s32 4294967295, %s746_s12   ;;  %s599_s14 = sadd.s32 4294967294, %s746_s12   ;;  %s746_s12 = sphi %s783_s12, %s958_s12   ;;  %s742_s11 = sphi %s781_s11, %s957_s11   ;;  %s738_s10 = sphi %s779_s10, %s956_s10   ;;  %s734_s9 = sphi %s777_s9, %s955_s9  }
   0x4   : > { %s802_s15 = sadd.s32 1, %s746_s12   ;;  %s69_s16 = sadd.s32 1, %s742_s11 }
   0x5   : > { %s66_s17 = ssub.s32 %s746_s12, %s802_s15  ;;  %p79_p0 = scmp.ne.s32.totalorder %s742_s11, %s738_s10 }
   0x6   : > { %p67_p1 = scmp.eq.s32.totalorder %s66_s17, 0  ;;  %p80_p2 = scmp.eq.s32.totalorder %s798_s13, 1 }
   0x7   : > { %p85_p3 = scmp.ne.s32.totalorder %s738_s10, %s734_s9  ;;  %p86_p4 = scmp.eq.s32.totalorder %s599_s14, 1 }
   0x8   : > { %s813_s18 = scalar_select %p67_p1, %s742_s11, %s69_s16  }
   0x9   : > { %p815_p5 = por %p80_p2, %p79_p0  ;;  %p819_p6 = por %p86_p4, %p85_p3 }
   0xa   : > { %p602_p7 = scmp.ge.s32.totalorder %s746_s12, 1  ;;  %p114_p8 = scmp.lt.s32.totalorder %s746_s12, 3 }
   0xc   : > { %p115_p9 = pnand %p602_p7, %p114_p8 }
   0xd   : > { %p135_p10 = scmp.lt.s32.totalorder (!%p115_p9), %s798_s13, 1  ;;  %v748_v0 = vmov (!%p115_p9), 0   ;;  %v749_v1 = vmov (!%p115_p9), 2   ;;  %v750_v3 = vmov (!%p115_p9), 1   ;;  %v751_v4 = vmov (!%p115_p9), 3   ;;  %s132_s28 = sand.u32 (!%p115_p9), 1, %s738_s10  }
   0xe   : > { %118 = sbr.rel (%p115_p9) target bundleno = 275 (0x113), region = 28  ;;  %675 = vset.pattern.permute.xlu0 (!%p115_p9), %v748_v0  ;;  %677 = vset.pattern.permute.xlu1 (!%p115_p9), %v749_v1  ;;  %v147_v5 = vlaneseq (!%p115_p9)  ;;  %v141_v9 = vld [vmem:[%s951_s1] sm:$0xf] (!%p115_p9)  ;;  %v752_v38 = vmov (!%p115_p9), 683565275   ;;  %s603_s29 = sshll.u32 (!%p115_p9), %s132_s28, 4 }
   0xf   : > { %v753_v40 = vmov (!%p115_p9), 2475754826   ;;  %v754_v43 = vmov (!%p115_p9), 2131351028   ;;  %v755_v46 = vmov (!%p115_p9), 2102212464  }
  0x10   : > { %v830_v6 = vshrl.u32 (!%p115_p9), %v147_v5, 7  ;;  %v756_v49 = vmov (!%p115_p9), 920167782   ;;  %v757_v52 = vmov (!%p115_p9), 1326507024   ;;  %s864_s30 = scalar_lea.vmem (!%p115_p9), [#allocation2], %s603_s29 }
  0x11   : > { %s618_s3 = sshll.u32 (!%p115_p9), %s798_s13, 8  ;;  %s537_s4 = sshll.u32 (!%p115_p9), %s864_s30, 4  ;;  %s895_s4 = int_to_ptr.vmem [resolvable:$true] %s537_s4 }
  0x12   : > { %v149_v7 = vsub.s32 (!%p115_p9), 0, %v830_v6  ;;  %v158_v8 = vsub.s32 (!%p115_p9), 1, %v830_v6  ;;  %v168_v11 = vsub.s32 (!%p115_p9), 2, %v830_v6  ;;  %v178_v13 = vsub.s32 (!%p115_p9), 3, %v830_v6  ;;  %s893_s7 = scalar_lea.hbm (!%p115_p9), %s952_s2, %s618_s3  ;;  %s909_s8 = scalar_lea.sflag (!%p115_p9), [#allocation3], %s132_s28 }
  0x13   : > { %s759_s14 = smov (!%p115_p9), [#allocation2]  }
  0x14   : > { %v150_v14 = vrot.slane (!%p115_p9), %v141_v9, %v149_v7  ;;  %v159_v15 = vrot.slane (!%p115_p9), %v141_v9, %v158_v8  ;;  %v169_v16 = vrot.slane (!%p115_p9), %v141_v9, %v168_v11  ;;  %v179_v17 = vrot.slane (!%p115_p9), %v141_v9, %v178_v13  ;;  %s688_s16 = sshll.u32 (!%p115_p9), %s759_s14, 4  ;;  %s689_s16 = int_to_ptr.vmem [resolvable:$false] %s688_s16 }
  0x15   : > { %s136_s21 = scalar_select %p135_p10, %s798_s13, 1 }
  0x16   : > { %s684_s13 = scalar_lea.vmem %s895_s4, 256  ;;  %s690_s17 = scalar_lea.vmem %s689_s16, 512 }
  0x17   : > { %s604_s22 = sshll.u32 %s136_s21, 3  ;;  %p685_p11 = scmp.ne.s32.totalorder %s895_s4, %s684_s13 }
  0x18   : > { %s138_s25 = scalar_lea.vmem %s950_s0, %s604_s22  ;;  %p691_p0 = scmp.lt.s32.totalorder %s895_s4, %s689_s16 }
  0x19   : > { %v140_v2 = vld [vmem:[%s138_s25] sm:$0xff]  ;;  %p686_p12 = pnand %p685_p11, %p815_p5  ;;  %p692_p1 = scmp.lt.s32.totalorder %s690_s17, %s684_s13 }
  0x1a   : > { %144 = vperm.xlu0 %675, %v140_v2   ;;  %163 = vperm.xlu1 %677, %v140_v2  }
  0x1b   : > { %p687_p13 = pneg %p686_p12  ;;  %p693_p2 = por %p692_p1, %p691_p0 }
  0x1d   : > { %p694_p3 = pnand %p693_p2, %p687_p13 }
  0x1e   : > { %676 = vset.pattern.permute.xlu0 %v750_v3  ;;  %678 = vset.pattern.permute.xlu1 %v751_v4 }
  0x1f   : > { %153 = vperm.xlu0 %676, %v140_v2   ;;  %173 = vperm.xlu1 %678, %v140_v2  }
  0x23   : > { %679 = vset.pattern.permute.xlu0 %v751_v4 }
  0x99   : > { %v145_v10 = vpop.permute.xlu0 %144  ;;  %v164_v12 = vpop.permute.xlu1 %163 }
  0x9a   : > { %v151_v20 = vmul.f32 %v150_v14, %v145_v10  ;;  %v170_v22 = vmul.f32 %v169_v16, %v164_v12 }
  0x9e   : > { %v154_v18 = vpop.permute.xlu0 %153  ;;  %v174_v19 = vpop.permute.xlu1 %173 }
  0x9f   : > { %v160_v21 = vmul.f32 %v159_v15, %v154_v18  ;;  %v180_v24 = vmul.f32 %v179_v17, %v174_v19 }
  0xa1   : > { %v161_v23 = vadd.f32 %v160_v21, %v151_v20 }
  0xa3   : > { %v171_v25 = vadd.f32 %v170_v22, %v161_v23 }
  0xa5   : > { %v181_v26 = vadd.f32 %v180_v24, %v171_v25 }
  0xa7   : > { %v839_v27 = vmul.f32 6.2831855, %v181_v26 }
  0xa9   : > { %v186_v28 = vand.u32 2139095040, %v839_v27  ;;  %v183_v32 = vand.u32 2147483647, %v839_v27  ;;  %vm185_vm7 = vcmp.lt.s32.totalorder %v839_v27, 0  ;;  %vm275_vm15 = vweird.f32 %v839_v27 }
  0xab   : > { %v187_v29 = vshrl.u32 %v186_v28, 23  ;;  %v190_v35 = vand.u32 8388607, %v183_v32  ;;  %vm184_vm8 = vcmp.le.f32.partialorder %v183_v32, 0.7853982 }
  0xad   : > { %v605_v30 = vadd.s32 4294967169, %v187_v29  ;;  %v191_v54 = vor.u32 8388608, %v190_v35 }
  0xaf   : > { %v193_v31 = vadd.s32 1, %v605_v30  ;;  %v231_v4 = vshll.u32 %v191_v54, 8 }
  0xb1   : > { %vm194_vm0 = vcmp.gt.s32.totalorder %v193_v31, 0 }
  0xb2   : > { %v195_v33 = vsel %vm194_vm0, %v193_v31, 0  ;;  %vm448_vm0 = vcmask 122880  }
  0xb3   : > { %v197_v34 = vand.u32 31, %v195_v33  ;;  %v196_v37 = vshrl.u32 %v195_v33, 5 }
  0xb5   : > { %v198_v36 = vsub.s32 32, %v197_v34  ;;  %v200_v39 = vshll.u32 %v752_v38, %v197_v34  ;;  %v203_v41 = vshll.u32 %v753_v40, %v197_v34  ;;  %v206_v45 = vshll.u32 %v754_v43, %v197_v34 }
  0xb6   : > { %v209_v48 = vshll.u32 %v755_v46, %v197_v34  ;;  %v212_v51 = vshll.u32 %v756_v49, %v197_v34  ;;  %vm215_vm1 = vcmp.lt.s32.totalorder %v196_v37, 1  ;;  %vm218_vm2 = vcmp.lt.s32.totalorder %v196_v37, 4 }
  0xb7   : > { %v201_v42 = vshrl.u32 %v753_v40, %v198_v36  ;;  %v204_v44 = vshrl.u32 %v754_v43, %v198_v36  ;;  %v207_v47 = vshrl.u32 %v755_v46, %v198_v36  ;;  %v210_v50 = vshrl.u32 %v756_v49, %v198_v36 }
  0xb8   : > { %v213_v53 = vshrl.u32 %v757_v52, %v198_v36  ;;  %v199_v63 = vshrl.u32 %v752_v38, %v198_v36  ;;  %vm217_vm3 = vcmp.lt.s32.totalorder %v196_v37, 3  ;;  %vm216_vm4 = vcmp.lt.s32.totalorder %v196_v37, 2 }
  0xb9   : > { %v202_v55 = vor.u32 %v201_v42, %v200_v39  ;;  %v205_v56 = vor.u32 %v204_v44, %v203_v41  ;;  %v208_v57 = vor.u32 %v207_v47, %v206_v45  ;;  %v211_v58 = vor.u32 %v210_v50, %v209_v48 }
  0xba   : > { %v214_v59 = vor.u32 %v213_v53, %v212_v51  ;;  %v758_v48 = vmov 1966171168  }
  0xbb   : > { %v220_v60 = vsel %vm218_vm2, %v208_v57, 2102212464  ;;  %v223_v61 = vsel %vm215_vm1, %v202_v55, %v205_v56  ;;  %v227_v62 = vsel %vm215_vm1, %v205_v56, %v208_v57  ;;  %v224_v0 = vsel %vm218_vm2, %v211_v58, 920167782 }
  0xbc   : > { %v228_v1 = vsel %vm218_vm2, %v214_v59, 1326507024  ;;  %v225_v2 = vsel %vm217_vm3, %v208_v57, %v224_v0  ;;  %v219_v5 = vsel %vm215_vm1, %v199_v63, %v202_v55  ;;  %v221_v7 = vsel %vm217_vm3, %v205_v56, %v220_v60 }
  0xbd   : > { %v229_v3 = vsel %vm217_vm3, %v211_v58, %v228_v1  ;;  %v226_v8 = vsel %vm216_vm4, %v223_v61, %v225_v2  ;;  %v222_v14 = vsel %vm216_vm4, %v219_v5, %v221_v7  ;;  %v393_v49 = vunpack.c.l.s4 %v758_v48 }
  0xbe   : > { %v230_v9 = vsel %vm216_vm4, %v227_v62, %v229_v3  ;;  %v848_v12 = vmul.u32.u64.low %v231_v4, %v226_v8  ;;  %v849_v13 = vmul.u32.u64.high %v231_v4, %v226_v8, %v848_v12  ;;  %v238_v16 = vmul.u32 %v231_v4, %v222_v14 }
  0xbf   : > { %v845_v10 = vmul.u32.u64.low %v231_v4, %v230_v9  ;;  %v846_v11 = vmul.u32.u64.high %v231_v4, %v230_v9, %v845_v10  ;;  %v394_v51 = vunpack.c.0.s8 %v393_v49 }
  0xc0   : > { %v241_v15 = vadd.s32 1, %v849_v13 }
  0xc1   : > { %vm240_vm5 = vc.u32 %v846_v11, %v848_v12  ;;  %v239_v29 = vadd.s32 %v848_v12, %v846_v11  ;;  %v397_v32 = vsub.s32 %v394_v51, %v830_v6 }
  0xc2   : > { %v242_v17 = vsel %vm240_vm5, %v241_v15, %v849_v13 }
  0xc3   : > { %v243_v18 = vadd.s32 %v242_v17, %v238_v16 }
  0xc5   : > { %v244_v19 = vadd.s32 536870912, %v243_v18 }
  0xc7   : > { %v245_v20 = vshrl.u32 %v244_v19, 30 }
  0xc9   : > { %v246_v21 = vshll.u32 %v245_v20, 30  ;;  %v269_v42 = vsub.s32 4, %v245_v20 }
  0xcb   : > { %v247_v22 = vsub.s32 %v243_v18, %v246_v21  ;;  %v270_v45 = vsel %vm185_vm7, %v269_v42, %v245_v20 }
  0xcc   : > { %v272_v47 = vsel %vm184_vm8, 0, %v270_v45 }
  0xcd   : > { %v249_v23 = vsub.s32 0, %v247_v22  ;;  %v379_v50 = vadd.s32 3, %v272_v47  ;;  %v276_v52 = vand.u32 3, %v272_v47 }
  0xcf   : > { %v606_v24 = vmin.u32 %v249_v23, %v247_v22  ;;  %v380_v53 = vand.u32 3, %v379_v50  ;;  %vm281_vm9 = vcmp.eq.s32.totalorder %v276_v52, 2  ;;  %vm278_vm11 = vcmp.eq.s32.totalorder %v276_v52, 0 }
  0xd0   : > { %vm277_vm13 = vcmp.lt.s32.totalorder %v276_v52, 2 }
  0xd1   : > { %v251_v25 = vclz %v606_v24  ;;  %vm385_vm10 = vcmp.eq.s32.totalorder %v380_v53, 2  ;;  %vm382_vm12 = vcmp.eq.s32.totalorder %v380_v53, 0  ;;  %vm381_vm14 = vcmp.lt.s32.totalorder %v380_v53, 2 }
  0xd3   : > { %v607_v26 = vadd.s32 4294967294, %v251_v25 }
  0xd5   : > { %vm608_vm6 = vcmp.lt.s32.totalorder %v607_v26, 0 }
  0xd6   : > { %v254_v28 = vsel %vm608_vm6, 0, %v607_v26 }
  0xd7   : > { %v255_v30 = vsub.s32 32, %v254_v28  ;;  %v259_v31 = vsub.s32 4294967266, %v254_v28  ;;  %v256_v33 = vshll.u32 %v247_v22, %v254_v28 }
  0xd9   : > { %v257_v34 = vshrl.u32 %v239_v29, %v255_v30  ;;  %v260_v35 = vadd.s32 127, %v259_v31 }
  0xdb   : > { %v258_v36 = vor.u32 %v257_v34, %v256_v33  ;;  %v261_v37 = vshll.u32 %v260_v35, 23 }
  0xdd   : > { %v262_v38 = vor.u32 4788187, %v261_v37  ;;  %v265_v40 = vcvt.s32.f32 %v258_v36 }
  0xdf   : > { %v263_v39 = vand.u32 2147483647, %v262_v38 }
  0xe1   : > { %v266_v41 = vmul.f32 %v265_v40, %v263_v39 }
  0xe3   : > { %v267_v43 = vxor.u32 2147483648, %v266_v41 }
  0xe5   : > { %v268_v44 = vsel %vm185_vm7, %v267_v43, %v266_v41 }
  0xe6   : > { %v271_v46 = vsel %vm184_vm8, %v839_v27, %v268_v44 }
  0xe7   : > { %680 = vcosq.f32 %v271_v46 }
  0xe8   : > { %682 = vsinq.f32 %v271_v46 }
  0xf1   : > { %v681_v54 = vpop.eup %680 }
  0xf2   : > { %v683_v55 = vpop.eup %682  ;;  %v282_v56 = vxor.u32 2147483648, %v681_v54 }
  0xf3   : > { %v279_v57 = vxor.u32 2147483648, %v683_v55 }
  0xf4   : > { %v283_v58 = vsel %vm281_vm9, %v282_v56, %v683_v55  ;;  %v387_v59 = vsel %vm385_vm10, %v282_v56, %v683_v55 }
  0xf5   : > { %v280_v60 = vsel %vm278_vm11, %v681_v54, %v279_v57  ;;  %v384_v61 = vsel %vm382_vm12, %v681_v54, %v279_v57 }
  0xf6   : > { %v284_v62 = vsel %vm277_vm13, %v280_v60, %v283_v58  ;;  %v388_v63 = vsel %vm381_vm14, %v384_v61, %v387_v59 }
  0xf7   : > { %v285_v0 = vsel %vm275_vm15, nan, %v284_v62  ;;  %v389_v6 = vsel %vm275_vm15, nan, %v388_v63 }
  0xf8   : > { %v391_v1 = vcombine.high %v285_v0, %v285_v0  ;;  %v398_v2 = vrot.slane %v285_v0, %v397_v32  ;;  %v458_v3 = vcombine.high %v389_v6, %v389_v6  ;;  %v465_v4 = vrot.slane %v389_v6, %v397_v32 }
  0xfa   : > { %v405_v5 = vrot.slane %v391_v1, %v397_v32  ;;  %v406_v7 = vcombine.high %v398_v2, %v398_v2  ;;  %v414_v8 = vrot.slane %v398_v2, %v397_v32  ;;  %v472_v9 = vrot.slane %v458_v3, %v397_v32 }
  0xfb   : > { %v473_v10 = vcombine.high %v465_v4, %v465_v4  ;;  %v481_v11 = vrot.slane %v465_v4, %v397_v32 }
  0xfc   : > { %v407_v12 = vcombine.high %v405_v5, %v405_v5  ;;  %v421_v13 = vrot.slane %v405_v5, %v397_v32  ;;  %v428_v14 = vrot.slane %v406_v7, %v397_v32  ;;  %v436_v27 = vcombine.high %v414_v8, %v414_v8  ;;  %449 = vst.msk [vmem:[%s864_s30] sm:$0x1] %vm448_vm0, %v414_v8 }
  0xfd   : > { %v474_v15 = vcombine.high %v472_v9, %v472_v9  ;;  %v488_v16 = vrot.slane %v472_v9, %v397_v32  ;;  %v495_v17 = vrot.slane %v473_v10, %v397_v32  ;;  %v503_v18 = vcombine.high %v481_v11, %v481_v11  ;;  %515 = vst.msk [vmem:[%s864_s30 + $0x1] sm:$0x1] %vm448_vm0, %v481_v11 }
  0xfe   : > { %v435_v19 = vrot.slane %v407_v12, %v397_v32  ;;  %v437_v20 = vcombine.high %v421_v13, %v421_v13  ;;  %v438_v21 = vcombine.high %v428_v14, %v428_v14  ;;  %450 = vst.msk [vmem:[%s864_s30 + $0x2] sm:$0x1] %vm448_vm0, %v428_v14  ;;  %451 = vst.msk [vmem:[%s864_s30 + $0x4] sm:$0x1] %vm448_vm0, %v436_v27 }
  0xff   : > { %453 = vst.msk [vmem:[%s864_s30 + $0x8] sm:$0x1] %vm448_vm0, %v421_v13  ;;  %v502_v22 = vrot.slane %v474_v15, %v397_v32  ;;  %v504_v23 = vcombine.high %v488_v16, %v488_v16  ;;  %v505_v24 = vcombine.high %v495_v17, %v495_v17  ;;  %516 = vst.msk [vmem:[%s864_s30 + $0x3] sm:$0x1] %vm448_vm0, %v495_v17 }
 0x100   : > { %517 = vst.msk [vmem:[%s864_s30 + $0x5] sm:$0x1] %vm448_vm0, %v503_v18  ;;  %519 = vst.msk [vmem:[%s864_s30 + $0x9] sm:$0x1] %vm448_vm0, %v488_v16  ;;  %v439_v25 = vcombine.high %v435_v19, %v435_v19 }
 0x101   : > { %452 = vst.msk [vmem:[%s864_s30 + $0x6] sm:$0x1] %vm448_vm0, %v438_v21  ;;  %454 = vst.msk [vmem:[%s864_s30 + $0xa] sm:$0x1] %vm448_vm0, %v435_v19  ;;  %v506_v26 = vcombine.high %v502_v22, %v502_v22 }
 0x102   : > { %455 = vst.msk [vmem:[%s864_s30 + $0xc] sm:$0x1] %vm448_vm0, %v437_v20  ;;  %518 = vst.msk [vmem:[%s864_s30 + $0x7] sm:$0x1] %vm448_vm0, %v505_v24 }
 0x103   : > { %520 = vst.msk [vmem:[%s864_s30 + $0xb] sm:$0x1] %vm448_vm0, %v502_v22  ;;  %521 = vst.msk [vmem:[%s864_s30 + $0xd] sm:$0x1] %vm448_vm0, %v504_v23 }
 0x104   : > { %456 = vst.msk [vmem:[%s864_s30 + $0xe] sm:$0x1] %vm448_vm0, %v439_v25  ;;  %522 = vst.msk [vmem:[%s864_s30 + $0xf] sm:$0x1] %vm448_vm0, %v506_v26 }
 0x105   : > { %697 = shalt.err (!%p694_p3)
}
 0x106   : > { %s698_s21 = scalar_lea.hbm %s893_s7, 256  ;;  %s702_s24 = scalar_lea.hbm %s952_s2, 512 }
 0x107   : > { %p699_p4 = scmp.ne.s32.totalorder %s893_s7, %s698_s21  ;;  %p703_p9 = scmp.lt.u32.totalorder %s893_s7, %s952_s2 }
 0x108   : > { %p704_p10 = scmp.lt.u32.totalorder %s702_s24, %s698_s21  ;;  %p706_p12 = scmp.lt.u32.totalorder %s698_s21, %s893_s7 }
 0x109   : > { %p700_p7 = pnand %p699_p4, %p815_p5 }
 0x10a   : > { %p705_p11 = por %p704_p10, %p703_p9 }
 0x10b   : > { %p701_p8 = pneg %p700_p7 }
 0x10c   : > { %p707_p13 = por %p706_p12, %p705_p11 }
 0x10e   : > { %p708_p0 = pnand %p707_p13, %p701_p8 }
 0x110   : > { %711 = shalt.err (!%p708_p0)
}
 0x111   : > { %s760_s27 = smov 32   ;;  %s761_s28 = smov 2  }
 0x112   : > { %623 = dma.vmem_to_hbm [thread:$0]  (%p815_p5), %s895_s4, 256, %s893_s7, %s909_s8, %s760_s27, %s760_s27, %s761_s28  }
 0x113 PF: > { %p629_p1 = scmp.ge.s32.totalorder %s746_s12, 2  ;;  %s552_s29 = sand.u32 1, %s734_s9  }
 0x114   : > { %s553_s30 = scalar_lea.sflag [#allocation3], %s552_s29 }
 0x115   : > { %p626_p2 = pnand %p629_p1, %p819_p6 }
 0x117   : > { %729 = dma.done.wait (!%p626_p2), %s553_s30, 256  }
 0x118   : > { %731 = vsyncadd (!%p626_p2), %s553_s30, 4294967040  ;;  %p12_p3 = scmp.ge.s32.totalorder %s802_s15, 4   ;;  %s955_s9 = smov %s738_s10 }
 0x119   : > { %s956_s10 = smov %s742_s11  ;;  %s957_s11 = smov %s813_s18 }
 0x11a   : > { %s958_s12 = smov %s802_s15  ;;  %14 = sbr.rel (!%p12_p3) target bundleno = 3 (0x3), region = 63 }
 0x121   :  { %558 = vsyncpa [#allocation3], 1 }
 0x122   :  { %560 = vsyncpa [#allocation3 + $0x1], 1 }

</bundles_post_ra>
